<compile_context>
chip_gen: v5e
topology: v5e:2x2
jax: 0.10.0
libtpu: 0.0.40
codegen_flags: <defaults>
</compile_context>

<pallas_src>
import functools

import jax
import jax.numpy as jnp
from jax.experimental import pallas as pl
from jax.experimental.pallas import tpu as pltpu


_OUT_SUB, _OUT_LANE = 8, 128  # one lane-dense f32 tile of partial sum per grid block


def _round_up(x, m):
    return ((x + m - 1) // m) * m


def _sublane_align(dtype):
    """Rows per packed sublane group for this dtype (8/16/32 for 4/2/1-byte)."""
    sz = jnp.dtype(dtype).itemsize
    if sz >= 4:
        return 8
    if sz == 2:
        return 16
    return 32


# ------------------------------- kernels -------------------------------------

def _margin_loss_kernel(p_ref, n_ref, out_ref, *, margin, total_rows, block_rows):
    # p_ref: [block_rows, 1|N] native dtype ; n_ref: [block_rows, N] native dtype
    p = p_ref[...].astype(jnp.float32)
    n = n_ref[...].astype(jnp.float32)
    clipped = jnp.maximum(p - n, -margin)                        # [bB, N]
    # Reduce along N first, then mask per *row* (one select per row, not per elem).
    row_sums = jnp.sum(clipped, axis=-1, keepdims=True)          # [bB, 1]
    row = (jax.lax.broadcasted_iota(jnp.int32, (block_rows, 1), 0)
           + pl.program_id(0) * block_rows)
    valid = row < total_rows                                     # [bB, 1]
    partial = jnp.sum(jnp.where(valid, row_sums, 0.0))           # scalar f32
    out_ref[...] = jnp.broadcast_to(partial, out_ref.shape)


def _margin_loss_adv_kernel(p_ref, n_ref, out_ref, *, margin, temp,
                            total_rows, block_rows, exp_bf16):
    p = p_ref[...].astype(jnp.float32)
    n = n_ref[...].astype(jnp.float32)
    clipped = jnp.maximum(p - n, -margin)                        # [bB, N]
    logits = n * (-temp)
    m = jnp.max(logits, axis=-1, keepdims=True)
    z = logits - m
    if exp_bf16:
        # v6e/v7x only: ~2x EUP exp throughput; sums stay f32. Not for v5e.
        e = jnp.exp(z.astype(jnp.bfloat16)).astype(jnp.float32)
    else:
        e = jnp.exp(z)                                           # unnormalized softmax
    num = jnp.sum(e * clipped, axis=-1, keepdims=True)           # [bB, 1]
    den = jnp.sum(e, axis=-1, keepdims=True)                     # [bB, 1]
    per_row = num * pl.reciprocal(den, approx=True)              # EUP divide, [bB, 1]
    row = (jax.lax.broadcasted_iota(jnp.int32, (block_rows, 1), 0)
           + pl.program_id(0) * block_rows)
    valid = row < total_rows
    partial = jnp.sum(jnp.where(valid, per_row, 0.0))            # scalar f32
    out_ref[...] = jnp.broadcast_to(partial, out_ref.shape)


# ------------------------------ wrappers --------------------------------------

def margin_loss_reference(p_score, n_score, margin=6.0, adv_temperature=None):
    """Pure-JAX reference (also the small-problem fallback)."""
    p = jnp.asarray(p_score, dtype=jnp.float32)
    n = jnp.asarray(n_score, dtype=jnp.float32)
    if p.ndim == 1:
        p = p[:, None]
    clipped = jnp.maximum(p - n, -margin)
    if adv_temperature is None:
        return (jnp.mean(clipped) + margin).reshape((1,))
    w = jax.nn.softmax(-n * adv_temperature, axis=-1)
    return (jnp.mean(jnp.sum(w * clipped, axis=-1)) + margin).reshape((1,))


def _choose_block_rows(n_rows, n_cols, dtype, target_bytes=8 * 1024 * 1024):
    """Pick block_rows so the n_score tile is ~8 MiB (double-buffered ~16 MiB),
    sublane-aligned for the dtype, and the grid has at least 2 blocks (v7x TCs)."""
    align = _sublane_align(dtype)
    itemsize = jnp.dtype(dtype).itemsize
    per_row = max(1, n_cols * itemsize)
    bb = target_bytes // per_row
    bb = max(align, min(8192, bb))
    bb = max(align, (bb // align) * align)
    # Keep >= 2 grid blocks so the "parallel" axis can shard across v7x's 2 TCs.
    if n_rows > 2 * align:
        half = _round_up((n_rows + 1) // 2, align)
        bb = min(bb, half)
    bb = min(bb, _round_up(n_rows, align))
    return int(max(bb, align))


def margin_loss(p_score, n_score, margin=6.0, adv_temperature=None,
                block_rows=None, min_pallas_elements=262144,
                adv_exp_bf16=False):
    """Returns a shape-(1,) float32 array, matching the torch module output."""
    p = jnp.asarray(p_score)
    n = jnp.asarray(n_score)
    if p.ndim == 1:
        p = p[:, None]
    assert n.ndim == 2, "n_score expected as [B, num_neg]"
    B, N = n.shape
    assert p.shape[0] == B and p.shape[1] in (1, N)

    # Tiny problems: fixed pallas_call overhead dwarfs the work -> fused XLA path.
    if B * N < min_pallas_elements:
        return margin_loss_reference(p, n, margin, adv_temperature)

    align = _sublane_align(n.dtype)
    if block_rows is None:
        block_rows = _choose_block_rows(B, N, n.dtype)
    else:
        block_rows = max(align, (int(block_rows) // align) * align)

    num_blocks = int(pl.cdiv(B, block_rows))
    b_pad = num_blocks * block_rows
    if b_pad != B:
        p = jnp.pad(p, ((0, b_pad - B), (0, 0)))   # zero rows contribute nothing
        n = jnp.pad(n, ((0, b_pad - B), (0, 0)))   # (and are masked in-kernel)
    n_p_cols = p.shape[1]

    if adv_temperature is None:
        kernel = functools.partial(_margin_loss_kernel,
                                   margin=float(margin),
                                   total_rows=B, block_rows=block_rows)
    else:
        kernel = functools.partial(_margin_loss_adv_kernel,
                                   margin=float(margin),
                                   temp=float(adv_temperature),
                                   total_rows=B, block_rows=block_rows,
                                   exp_bf16=bool(adv_exp_bf16))

    partials = pl.pallas_call(
        kernel,
        out_shape=jax.ShapeDtypeStruct((num_blocks, _OUT_SUB, _OUT_LANE),
                                       jnp.float32),
        grid=(num_blocks,),
        in_specs=[
            pl.BlockSpec((block_rows, n_p_cols), lambda i: (i, 0)),
            pl.BlockSpec((block_rows, N), lambda i: (i, 0)),
        ],
        out_specs=pl.BlockSpec((1, _OUT_SUB, _OUT_LANE), lambda i: (i, 0, 0)),
        compiler_params=pltpu.CompilerParams(
            dimension_semantics=("parallel",),        # independent per-block partials
            # ~8 MiB tile double-buffered (~16-17 MiB incl. p/out) << 48 MiB,
            # which itself fits v7x's 64 MiB physical VMEM (128 MiB on v5e/v6e).
            vmem_limit_bytes=48 * 1024 * 1024,
        ),
    )(p, n)

    total = jnp.sum(partials[:, 0, 0])               # tiny second-phase reduction
    if adv_temperature is None:
        loss = total / float(B * N) + margin
    else:
        loss = total / float(B) + margin
    return loss.reshape((1,)).astype(jnp.float32)


# -------------------------------- main ----------------------------------------

if __name__ == "__main__":
    key = jax.random.PRNGKey(0)
    MARGIN, ADV_T = 6.0, 1.0

    # --- case 1: aligned shapes, f32, multi-block (>=2) grid --------------------
    k1, k2, k3, k4 = jax.random.split(key, 4)
    B1, N1 = 512, 256
    p1 = jax.random.normal(k1, (B1, 1), dtype=jnp.float32)
    n1 = jax.random.normal(k2, (B1, N1), dtype=jnp.float32)

    out = jax.block_until_ready(
        margin_loss(p1, n1, margin=MARGIN, min_pallas_elements=0))
    ref = margin_loss_reference(p1, n1, margin=MARGIN)
    assert out.shape == (1,)
    assert jnp.allclose(out, ref, atol=1e-4, rtol=1e-5), (out, ref)

    out_adv = jax.block_until_ready(
        margin_loss(p1, n1, margin=MARGIN, adv_temperature=ADV_T,
                    min_pallas_elements=0))
    ref_adv = margin_loss_reference(p1, n1, margin=MARGIN, adv_temperature=ADV_T)
    # approx reciprocal in the adv kernel -> slightly looser tolerance
    assert jnp.allclose(out_adv, ref_adv, atol=5e-3, rtol=5e-3), (out_adv, ref_adv)

    # --- case 2: ragged batch (B not a multiple of the block), multi-block grid -
    B2, N2 = 300, 384
    p2 = jax.random.normal(k3, (B2, 1), dtype=jnp.float32)
    n2 = jax.random.normal(k4, (B2, N2), dtype=jnp.float32)

    out2 = jax.block_until_ready(
        margin_loss(p2, n2, margin=MARGIN, block_rows=128, min_pallas_elements=0))
    ref2 = margin_loss_reference(p2, n2, margin=MARGIN)
    assert jnp.allclose(out2, ref2, atol=1e-4, rtol=1e-5), (out2, ref2)

    out2_adv = jax.block_until_ready(
        margin_loss(p2, n2, margin=MARGIN, adv_temperature=ADV_T,
                    block_rows=128, min_pallas_elements=0))
    ref2_adv = margin_loss_reference(p2, n2, margin=MARGIN, adv_temperature=ADV_T)
    assert jnp.allclose(out2_adv, ref2_adv, atol=5e-3, rtol=5e-3), (out2_adv, ref2_adv)

    # --- case 3: native bf16 scores (halved HBM traffic, f32 math in-kernel,
    #             16-row sublane alignment) --------------------------------------
    p3 = p1.astype(jnp.bfloat16)
    n3 = n1.astype(jnp.bfloat16)
    out3 = jax.block_until_ready(
        margin_loss(p3, n3, margin=MARGIN, min_pallas_elements=0))
    ref3 = margin_loss_reference(p3, n3, margin=MARGIN)
    assert jnp.allclose(out3, ref3, atol=1e-3, rtol=1e-3), (out3, ref3)

    # --- case 4: small problem takes the fused pure-JAX fallback ----------------
    p4 = jax.random.normal(k1, (16, 1), dtype=jnp.float32)
    n4 = jax.random.normal(k2, (16, 25), dtype=jnp.float32)
    out4 = jax.block_until_ready(margin_loss(p4, n4, margin=MARGIN))
    ref4 = margin_loss_reference(p4, n4, margin=MARGIN)
    assert jnp.allclose(out4, ref4, atol=1e-5, rtol=1e-6), (out4, ref4)

    print("KERNEL_OK")
</pallas_src>

<mosaic_0001>
module attributes {stable_mosaic.version = 11 : i64} {
  func.func @_margin_loss_kernel(%arg0: i32, %arg1: memref<256x1xf32, #tpu.memory_space<vmem>>, %arg2: memref<256x256xf32, #tpu.memory_space<vmem>>, %arg3: memref<1x8x128xf32, #tpu.memory_space<vmem>>) attributes {dimension_semantics = [#tpu.dimension_semantics<parallel>], iteration_bounds = array<i64: 2>, scalar_prefetch = 0 : i64, scratch_operands = 0 : i64, tpu.core_type = #tpu.core_type<tc>, window_params = [{transform_indices = @transform_0, window_bounds = array<i64: 256, 1>}, {transform_indices = @transform_1, window_bounds = array<i64: 256, 256>}, {transform_indices = @transform_2, window_bounds = array<i64: 1, 8, 128>}]} {
    %c0 = arith.constant 0 : index
    %c0_0 = arith.constant 0 : index
    %0 = vector.load %arg1[%c0, %c0_0] : memref<256x1xf32, #tpu.memory_space<vmem>>, vector<256x1xf32>
    %c0_1 = arith.constant 0 : index
    %c0_2 = arith.constant 0 : index
    %1 = vector.load %arg2[%c0_1, %c0_2] : memref<256x256xf32, #tpu.memory_space<vmem>>, vector<256x256xf32>
    %2 = vector.broadcast %0 : vector<256x1xf32> to vector<256x256xf32>
    %3 = arith.subf %2, %1 : vector<256x256xf32>
    %cst = arith.constant -6.000000e+00 : f32
    %4 = vector.broadcast %cst : f32 to vector<256x256xf32>
    %5 = arith.maximumf %3, %4 : vector<256x256xf32>
    %cst_3 = arith.constant dense<0.000000e+00> : vector<256xf32>
    %6 = vector.multi_reduction <add>, %5, %cst_3 [1] : vector<256x256xf32> to vector<256xf32>
    %7 = vector.shape_cast %6 : vector<256xf32> to vector<256x1xf32>
    %8 = tpu.iota {dimensions = array<i32: 0>} : vector<256x1xi32>
    %c256_i32 = arith.constant 256 : i32
    %9 = arith.muli %arg0, %c256_i32 : i32
    %10 = vector.broadcast %9 : i32 to vector<256x1xi32>
    %11 = arith.addi %8, %10 : vector<256x1xi32>
    %c512_i32 = arith.constant 512 : i32
    %12 = vector.broadcast %c512_i32 : i32 to vector<256x1xi32>
    %13 = arith.cmpi slt, %11, %12 : vector<256x1xi32>
    %cst_4 = arith.constant 0.000000e+00 : f32
    %14 = vector.broadcast %cst_4 : f32 to vector<256x1xf32>
    %15 = arith.select %13, %7, %14 : vector<256x1xi1>, vector<256x1xf32>
    %16 = vector.shape_cast %15 : vector<256x1xf32> to vector<1x256x1xf32>
    %cst_5 = arith.constant dense<0.000000e+00> : vector<1xf32>
    %17 = vector.multi_reduction <add>, %16, %cst_5 [1, 2] : vector<1x256x1xf32> to vector<1xf32>
    %18 = vector.shape_cast %17 : vector<1xf32> to vector<1x1x1xf32>
    %19 = vector.extract %18[0, 0, 0] : f32 from vector<1x1x1xf32>
    %20 = vector.broadcast %19 : f32 to vector<1x8x128xf32>
    %c0_6 = arith.constant 0 : index
    %c0_7 = arith.constant 0 : index
    %c0_8 = arith.constant 0 : index
    %21 = vector.load %arg3[%c0_6, %c0_7, %c0_8] : memref<1x8x128xf32, #tpu.memory_space<vmem>>, vector<1x8x128xf32>
    tpu.vector_store %arg3[%c0_6, %c0_7, %c0_8], %20 {strides = array<i32>} : memref<1x8x128xf32, #tpu.memory_space<vmem>>, vector<1x8x128xf32>,
    return
  }
  func.func @transform_0(%arg0: i32) -> (i32, i32) {
    %c0_i32 = arith.constant 0 : i32
    %c0_i32_0 = arith.constant 0 : i32
    return %arg0, %c0_i32 : i32, i32
  }
  func.func @transform_1(%arg0: i32) -> (i32, i32) {
    %c0_i32 = arith.constant 0 : i32
    %c0_i32_0 = arith.constant 0 : i32
    return %arg0, %c0_i32 : i32, i32
  }
  func.func @transform_2(%arg0: i32) -> (i32, i32, i32) {
    %c0_i32 = arith.constant 0 : i32
    %c0_i32_0 = arith.constant 0 : i32
    %c0_i32_1 = arith.constant 0 : i32
    return %arg0, %c0_i32, %c0_i32_0 : i32, i32, i32
  }
}

</mosaic_0001>

<bundles_post_ra>
// kernel: tpu_custom_call.1
= control target key start
LH: loop header
LB: loop body
LE: loop exit
PB: predicated region body
PF: predicated region fallthrough
CT: control target
= control target key end

     0   :  { %7 = vsyncpa [#allocation3], 0  ;;  %s1537_s0 = inlined_call_operand.vmem [shape: f32[512,1], index: 0, kind: input, shape index: {}]   ;;  %s1538_s1 = inlined_call_operand.hbm [shape: f32[512,256], index: 1, kind: input, shape index: {}]   ;;  %s1539_s2 = inlined_call_operand.hbm [shape: f32[2,8,128], index: 2, kind: output, shape index: {}]  }
   0x1   :  { %9 = vsyncpa [#allocation3 + $0x1], 0 }
   0x2   :  { %10 = vsyncpa [#allocation4], 0 }
   0x3   :  { %12 = vsyncpa [#allocation4 + $0x1], 0  ;;  %s1161_s9 = smov 0   ;;  %s1163_s10 = smov 0  }
   0x4   :  { %s1165_s11 = smov 0   ;;  %s1167_s12 = smov 0  }
   0x5 LB: > { %s1182_s13 = sadd.s32 4294967295, %s1141_s12   ;;  %s972_s14 = sadd.s32 4294967294, %s1141_s12   ;;  %s1141_s12 = sphi %s1167_s12, %s1549_s12   ;;  %s1137_s11 = sphi %s1165_s11, %s1548_s11   ;;  %s1133_s10 = sphi %s1163_s10, %s1547_s10   ;;  %s1129_s9 = sphi %s1161_s9, %s1546_s9  }
   0x6   : > { %s1186_s15 = sadd.s32 1, %s1141_s12   ;;  %s51_s16 = sadd.s32 1, %s1137_s11 }
   0x7   : > { %s48_s17 = ssub.s32 %s1141_s12, %s1186_s15  ;;  %p58_p0 = scmp.ne.s32.totalorder %s1137_s11, %s1133_s10 }
   0x8   : > { %p49_p1 = scmp.eq.s32.totalorder %s48_s17, 0  ;;  %p59_p2 = scmp.eq.s32.totalorder %s1141_s12, 0 }
   0x9   : > { %p64_p3 = scmp.ne.s32.totalorder %s1133_s10, %s1129_s9  ;;  %p65_p4 = scmp.eq.s32.totalorder %s1182_s13, 0 }
   0xa   : > { %s1198_s18 = scalar_select %p49_p1, %s1137_s11, %s51_s16  }
   0xb   : > { %p1200_p5 = por %p59_p2, %p58_p0  ;;  %p1204_p6 = por %p65_p4, %p64_p3 }
   0xc   : > { %p88_p7 = scmp.eq.s32.totalorder %s1182_s13, 1  ;;  %p94_p8 = scmp.eq.s32.totalorder %s972_s14, 1 }
   0xd   : > { %p1005_p10 = scmp.lt.s32.totalorder %s1141_s12, 2  ;;  %s123_s23 = sand.u32 1, %s1137_s11  }
   0xe   : > { %p1211_p11 = por %p88_p7, %p58_p0  ;;  %p1215_p12 = por %p94_p8, %p64_p3 }
   0xf   : > { %s990_s24 = sshll.u32 %s1141_s12, 9  ;;  %s975_s25 = sshll.u32 %s123_s23, 9 }
  0x10   : > { %s133_s28 = scalar_lea.hbm %s1538_s1, %s990_s24  ;;  %s127_s30 = scalar_lea.vmem [#allocation2], %s975_s25 }
  0x11   : > { %s134_s29 = sshll.u32 %s133_s28, 4  ;;  %s136_s3 = sshll.u32 %s127_s30, 4  ;;  %s135_s29 = int_to_ptr.hbm [resolvable:$true] %s134_s29  ;;  %s137_s3 = int_to_ptr.vmem [resolvable:$true] %s136_s3 }
  0x12   : > { %p1226_p13 = pnand %p1005_p10, %p1200_p5  ;;  %p979_p0 = scmp.ge.s32.totalorder %s1141_s12, 1 }
  0x13   : > { %p144_p1 = scmp.lt.s32.totalorder %s1141_s12, 3  ;;  %s124_s5 = scalar_lea.sflag [#allocation3], %s123_s23 }
  0x14   : > { %s1045_s6 = sshra.s32 %s135_s29, 4  ;;  %p1049_p3 = pneg %p1226_p13  ;;  %s1046_s6 = int_to_ptr.hbm [resolvable:$true] %s1045_s6 }
  0x15   : > { %s1047_s7 = scalar_lea.hbm %s1046_s6, 512  ;;  %s1052_s16 = scalar_lea.hbm %s1538_s1, 1024 }
  0x16   : > { %p1048_p2 = scmp.ne.s32.totalorder %s1046_s6, %s1047_s7  ;;  %p1053_p5 = scmp.lt.s32.totalorder %s1046_s6, %s1538_s1 }
  0x17   : > { %p1054_p8 = scmp.lt.s32.totalorder %s1052_s16, %s1047_s7 }
  0x18   : > { %p1050_p4 = pnand %p1049_p3, %p1048_p2 }
  0x19   : > { %p1055_p10 = por %p1054_p8, %p1053_p5 }
  0x1a   : > { %p1051_p7 = pneg %p1050_p4 }
  0x1c   : > { %p1056_p9 = pnand %p1055_p10, %p1051_p7 }
  0x1e   : > { %1059 = shalt.err (!%p1056_p9)
}
  0x1f   : > { %s1143_s23 = smov 256   ;;  %s1144_s24 = smov 16  }
  0x20   : > { %1000 = dma.hbm_to_vmem [thread:$0]  (!%p1226_p13), %s135_s29, 8192, %s137_s3, %s124_s5, %s1143_s23, %s1143_s23, %s1144_s24  }
  0x21   : > { %p145_p2 = pnand %p979_p0, %p144_p1 }
  0x22   : > { %s1247_s25 = sand.u32 (!%p145_p2), 1, %s1133_s10  }
  0x23   : > { %148 = sbr.rel (%p145_p2) target bundleno = 657 (0x291), region = 28  ;;  %s980_s26 = sshll.u32 (!%p145_p2), %s1247_s25, 9 }
  0x24   : > { %s151_s27 = scalar_lea.sflag (!%p145_p2), [#allocation3], %s1247_s25  ;;  %s1251_s28 = scalar_lea.vmem (!%p145_p2), [#allocation2], %s980_s26 }
  0x28   : > { %1120 = dma.done.wait (%p1204_p6), %s151_s27, 8192  }
  0x29   : > { %1122 = vsyncadd (%p1204_p6), %s151_s27, 4294959104  ;;  %s982_s29 = sshll.u32 %s1182_s13, 5  ;;  %v1145_v0 = vmov 0   ;;  %v224_v26 = vld [vmem:[%s1251_s28 + $0x20] sm:$0xff]  ;;  %v225_v27 = vld [vmem:[%s1251_s28 + $0x28] sm:$0xff]  ;;  %s984_s20 = sshll.u32 %s1182_s13, 8 }
  0x2a   : > { %1044 = vset.pattern.permute.xlu2 %v1145_v0  ;;  %1043 = vset.pattern.permute.xlu1 %v1145_v0  ;;  %p182_p9 = scmp.lt.s32.totalorder %s982_s29, 63  ;;  %v220_v28 = vld [vmem:[%s1251_s28] sm:$0xff]  ;;  %v221_v29 = vld [vmem:[%s1251_s28 + $0x8] sm:$0xff]  ;;  %v230_v36 = vld [vmem:[%s1251_s28 + $0x50] sm:$0xff]  ;;  %vm799_vm3 = vcmask 7168   ;;  %s981_s6 = sshll.u32 %s1247_s25, 3 }
  0x2b   : > { %1042 = vset.pattern.permute.xlu0 %v1145_v0  ;;  %v231_v37 = vld [vmem:[%s1251_s28 + $0x58] sm:$0xff]  ;;  %v222_v47 = vld [vmem:[%s1251_s28 + $0x10] sm:$0xff]  ;;  %s986_s7 = sshll.u32 %s1182_s13, 3  ;;  %s180_s17 = scalar_lea.vmem [#allocation5], %s981_s6 }
  0x2c   : > { %s1551_s29 = smov (!%p182_p9, %s982_s29), 63  ;;  %v223_v48 = vld [vmem:[%s1251_s28 + $0x18] sm:$0xff]  ;;  %v226_v54 = vld [vmem:[%s1251_s28 + $0x30] sm:$0xff]  ;;  %s885_s16 = scalar_lea.hbm %s1539_s2, %s986_s7 }
  0x2d   : > { %s983_s30 = sshll.u32 %s1551_s29, 3  ;;  %v227_v55 = vld [vmem:[%s1251_s28 + $0x38] sm:$0xff]  ;;  %s887_s19 = sshll.u32 %s180_s17, 4  ;;  %s888_s19 = int_to_ptr.vmem [resolvable:$true] %s887_s19 }
  0x2e   : > { %s1261_s5 = scalar_lea.vmem %s1537_s0, %s983_s30  ;;  %s889_s23 = sshll.u32 %s885_s16, 4  ;;  %s890_s23 = int_to_ptr.hbm [resolvable:$true] %s889_s23 }
  0x2f   : > { %v192_v1 = vld [vmem:[%s1261_s5 + $0x20] sm:$0xff]  ;;  %v190_v2 = vld [vmem:[%s1261_s5 + $0x10] sm:$0xff]  ;;  %v193_v4 = vld [vmem:[%s1261_s5 + $0x28] sm:$0xff]  ;;  %s875_s26 = scalar_lea.sflag [#allocation4], %s1247_s25  ;;  %s1089_s27 = sshra.s32 %s890_s23, 4  ;;  %s1090_s27 = int_to_ptr.hbm [resolvable:$true] %s1089_s27 }
  0x30   : > { %v188_v3 = vld [vmem:[%s1261_s5] sm:$0xff]  ;;  %306 = vperm.xlu2 %1044, %v192_v1   ;;  %296 = vperm.xlu1 %1043, %v190_v2   ;;  %v191_v5 = vld [vmem:[%s1261_s5 + $0x18] sm:$0xff]  ;;  %v189_v6 = vld [vmem:[%s1261_s5 + $0x8] sm:$0xff]  ;;  %s1095_s30 = scalar_lea.hbm %s1539_s2, 16  ;;  %p1096_p1 = scmp.lt.s32.totalorder %s1090_s27, %s1539_s2 }
  0x31   : > { %286 = vperm.xlu0 %1042, %v188_v3   ;;  %v196_v7 = vld [vmem:[%s1261_s5 + $0x40] sm:$0xff]  ;;  %v195_v8 = vld [vmem:[%s1261_s5 + $0x38] sm:$0xff]  ;;  %v194_v9 = vld [vmem:[%s1261_s5 + $0x30] sm:$0xff] }
  0x32   : > { %v199_v10 = vld [vmem:[%s1261_s5 + $0x58] sm:$0xff]  ;;  %v198_v11 = vld [vmem:[%s1261_s5 + $0x50] sm:$0xff]  ;;  %v197_v12 = vld [vmem:[%s1261_s5 + $0x48] sm:$0xff] }
  0x33   : > { %v202_v13 = vld [vmem:[%s1261_s5 + $0x70] sm:$0xff]  ;;  %v201_v14 = vld [vmem:[%s1261_s5 + $0x68] sm:$0xff]  ;;  %v200_v15 = vld [vmem:[%s1261_s5 + $0x60] sm:$0xff] }
  0x34   : > { %v205_v16 = vld [vmem:[%s1261_s5 + $0x88] sm:$0xff]  ;;  %v204_v17 = vld [vmem:[%s1261_s5 + $0x80] sm:$0xff]  ;;  %v203_v18 = vld [vmem:[%s1261_s5 + $0x78] sm:$0xff] }
  0x35   : > { %v208_v19 = vld [vmem:[%s1261_s5 + $0xa0] sm:$0xff]  ;;  %v207_v20 = vld [vmem:[%s1261_s5 + $0x98] sm:$0xff]  ;;  %v210_v22 = vld [vmem:[%s1261_s5 + $0xb0] sm:$0xff] }
  0x36   : > { %v211_v21 = vld [vmem:[%s1261_s5 + $0xb8] sm:$0xff]  ;;  %v212_v23 = vld [vmem:[%s1261_s5 + $0xc0] sm:$0xff]  ;;  %v214_v24 = vld [vmem:[%s1261_s5 + $0xd0] sm:$0xff] }
  0x37   : > { %v228_v1 = vld [vmem:[%s1251_s28 + $0x40] sm:$0xff]  ;;  %v229_v2 = vld [vmem:[%s1251_s28 + $0x48] sm:$0xff] }
  0x38   : > { %311 = vperm.xlu2 %1044, %v193_v4   ;;  %301 = vperm.xlu1 %1043, %v191_v5  }
  0x39   : > { %291 = vperm.xlu0 %1042, %v189_v6  }
  0x40   : > { %326 = vperm.xlu2 %1044, %v196_v7   ;;  %321 = vperm.xlu1 %1043, %v195_v8   ;;  %v216_v8 = vld [vmem:[%s1261_s5 + $0xe0] sm:$0xff] }
  0x41   : > { %316 = vperm.xlu0 %1042, %v194_v9  }
  0x48   : > { %341 = vperm.xlu2 %1044, %v199_v10   ;;  %336 = vperm.xlu1 %1043, %v198_v11   ;;  %v206_v10 = vld [vmem:[%s1261_s5 + $0x90] sm:$0xff]  ;;  %v209_v11 = vld [vmem:[%s1261_s5 + $0xa8] sm:$0xff] }
  0x49   : > { %331 = vperm.xlu0 %1042, %v197_v12   ;;  %v213_v12 = vld [vmem:[%s1261_s5 + $0xc8] sm:$0xff] }
  0x50   : > { %356 = vperm.xlu2 %1044, %v202_v13   ;;  %351 = vperm.xlu1 %1043, %v201_v14   ;;  %v215_v14 = vld [vmem:[%s1261_s5 + $0xd8] sm:$0xff] }
  0x51   : > { %346 = vperm.xlu0 %1042, %v200_v15  }
  0x58   : > { %371 = vperm.xlu2 %1044, %v205_v16   ;;  %366 = vperm.xlu1 %1043, %v204_v17   ;;  %v218_v16 = vld [vmem:[%s1261_s5 + $0xf0] sm:$0xff]  ;;  %v232_v17 = vld [vmem:[%s1251_s28 + $0x60] sm:$0xff] }
  0x59   : > { %361 = vperm.xlu0 %1042, %v203_v18   ;;  %v233_v18 = vld [vmem:[%s1251_s28 + $0x68] sm:$0xff] }
  0x60   : > { %386 = vperm.xlu2 %1044, %v208_v19   ;;  %381 = vperm.xlu1 %1043, %v207_v20  }
  0x68   : > { %401 = vperm.xlu2 %1044, %v211_v21   ;;  %396 = vperm.xlu1 %1043, %v210_v22  }
  0x70   : > { %406 = vperm.xlu2 %1044, %v212_v23   ;;  %v217_v23 = vld [vmem:[%s1261_s5 + $0xe8] sm:$0xff] }
  0x78   : > { %416 = vperm.xlu2 %1044, %v214_v24  }
  0x8a   : > { %v307_v25 = vpop.permute.xlu2 %306 }
  0x8b   : > { %v452_v3 = vsub.f32 %v307_v25, %v228_v1  ;;  %v453_v4 = vsub.f32 %v307_v25, %v229_v2  ;;  %v219_v25 = vld [vmem:[%s1261_s5 + $0xf8] sm:$0xff]  ;;  %v240_v2 = vld [vmem:[%s1251_s28 + $0xa0] sm:$0xff] }
  0x8d   : > { %v516_v6 = vmax.f32 %v452_v3, -6.0  ;;  %v517_v7 = vmax.f32 %v453_v4, -6.0  ;;  %v241_v3 = vld [vmem:[%s1251_s28 + $0xa8] sm:$0xff] }
  0x8f   : > { %v584_v9 = vadd.f32 %v517_v7, %v516_v6  ;;  %v252_v6 = vld [vmem:[%s1251_s28 + $0x100] sm:$0xff]  ;;  %v253_v7 = vld [vmem:[%s1251_s28 + $0x108] sm:$0xff] }
  0x92   : > { %v312_v42 = vpop.permute.xlu2 %311 }
  0x93   : > { %v454_v44 = vsub.f32 %v312_v42, %v230_v36  ;;  %v455_v45 = vsub.f32 %v312_v42, %v231_v37  ;;  %v238_v37 = vld [vmem:[%s1251_s28 + $0x90] sm:$0xff] }
  0x95   : > { %v518_v50 = vmax.f32 %v454_v44, -6.0  ;;  %v519_v51 = vmax.f32 %v455_v45, -6.0 }
  0x97   : > { %v587_v61 = vadd.f32 %v519_v51, %v518_v50 }
  0x9a   : > { %v327_v13 = vpop.permute.xlu2 %326 }
  0xa2   : > { %v297_v30 = vpop.permute.xlu1 %296  ;;  %v1309_v20 = vpop.permute.xlu2 %341 }
  0xa3   : > { %v448_v31 = vsub.f32 %v297_v30, %v224_v26  ;;  %v449_v32 = vsub.f32 %v297_v30, %v225_v27  ;;  %v287_v33 = vpop.permute.xlu0 %286 }
  0xa4   : > { %v444_v34 = vsub.f32 %v287_v33, %v220_v28  ;;  %v445_v35 = vsub.f32 %v287_v33, %v221_v29  ;;  %v236_v28 = vld [vmem:[%s1251_s28 + $0x80] sm:$0xff]  ;;  %v237_v29 = vld [vmem:[%s1251_s28 + $0x88] sm:$0xff] }
  0xa5   : > { %v512_v38 = vmax.f32 %v448_v31, -6.0  ;;  %v513_v39 = vmax.f32 %v449_v32, -6.0  ;;  %v460_v30 = vsub.f32 %v327_v13, %v236_v28  ;;  %v461_v31 = vsub.f32 %v327_v13, %v237_v29  ;;  %v242_v13 = vld [vmem:[%s1251_s28 + $0xb0] sm:$0xff] }
  0xa6   : > { %v508_v40 = vmax.f32 %v444_v34, -6.0  ;;  %v509_v41 = vmax.f32 %v445_v35, -6.0 }
  0xa7   : > { %v578_v43 = vadd.f32 %v513_v39, %v512_v38  ;;  %v524_v35 = vmax.f32 %v460_v30, -6.0  ;;  %v525_v36 = vmax.f32 %v461_v31, -6.0  ;;  %v239_v38 = vld [vmem:[%s1251_s28 + $0x98] sm:$0xff] }
  0xa8   : > { %v572_v46 = vadd.f32 %v509_v41, %v508_v40 }
  0xa9   : > { %579 = vadd.xlane.f32.xlu2 %v578_v43  ;;  %v596_v42 = vadd.f32 %v525_v36, %v524_v35  ;;  %v247_v35 = vld [vmem:[%s1251_s28 + $0xd8] sm:$0xff] }
  0xaa   : > { %573 = vadd.xlane.f32.xlu0 %v572_v46  ;;  %v302_v58 = vpop.permute.xlu1 %301  ;;  %v357_v33 = vpop.permute.xlu2 %356  ;;  %v244_v46 = vld [vmem:[%s1251_s28 + $0xc0] sm:$0xff] }
  0xab   : > { %v292_v49 = vpop.permute.xlu0 %291  ;;  %v450_v59 = vsub.f32 %v302_v58, %v226_v54  ;;  %v451_v60 = vsub.f32 %v302_v58, %v227_v55  ;;  %v248_v55 = vld [vmem:[%s1251_s28 + $0xe0] sm:$0xff] }
  0xac   : > { %v446_v52 = vsub.f32 %v292_v49, %v222_v47  ;;  %v447_v53 = vsub.f32 %v292_v49, %v223_v48  ;;  %v245_v47 = vld [vmem:[%s1251_s28 + $0xc8] sm:$0xff]  ;;  %v472_v58 = vsub.f32 %v357_v33, %v248_v55 }
  0xad   : > { %v514_v63 = vmax.f32 %v450_v59, -6.0  ;;  %v515_v0 = vmax.f32 %v451_v60, -6.0  ;;  %v234_v60 = vld [vmem:[%s1251_s28 + $0x70] sm:$0xff] }
  0xae   : > { %v510_v56 = vmax.f32 %v446_v52, -6.0  ;;  %v511_v57 = vmax.f32 %v447_v53, -6.0  ;;  %v536_v4 = vmax.f32 %v472_v58, -6.0 }
  0xaf   : > { %v581_v5 = vadd.f32 %v515_v0, %v514_v63 }
  0xb0   : > { %v575_v62 = vadd.f32 %v511_v57, %v510_v56  ;;  %v249_v56 = vld [vmem:[%s1251_s28 + $0xe8] sm:$0xff] }
  0xb1   : > { %v473_v59 = vsub.f32 %v357_v33, %v249_v56 }
  0xb2   : > { %588 = vadd.xlane.f32.xlu0 %v587_v61  ;;  %576 = vadd.xlane.f32.xlu1 %v575_v62  ;;  %v1304_v15 = vpop.permute.xlu1 %321  ;;  %v1321_v43 = vpop.permute.xlu2 %371  ;;  %v235_v61 = vld [vmem:[%s1251_s28 + $0x78] sm:$0xff] }
  0xb3   : > { %v317_v19 = vpop.permute.xlu0 %316  ;;  %v458_v0 = vsub.f32 %v1304_v15, %v234_v60  ;;  %v459_v1 = vsub.f32 %v1304_v15, %v235_v61  ;;  %v254_v61 = vld [vmem:[%s1251_s28 + $0x110] sm:$0xff] }
  0xb4   : > { %v456_v21 = vsub.f32 %v317_v19, %v232_v17  ;;  %v457_v22 = vsub.f32 %v317_v19, %v233_v18 }
  0xb6   : > { %v520_v26 = vmax.f32 %v456_v21, -6.0  ;;  %v521_v27 = vmax.f32 %v457_v22, -6.0  ;;  %v466_v21 = vsub.f32 %v1309_v20, %v242_v13 }
  0xb8   : > { %v590_v32 = vadd.f32 %v521_v27, %v520_v26 }
  0xba   : > { %582 = vadd.xlane.f32.xlu1 %v581_v5  ;;  %v1312_v24 = vpop.permute.xlu1 %336  ;;  %v1327_v57 = vpop.permute.xlu2 %386  ;;  %v537_v5 = vmax.f32 %v473_v59, -6.0 }
  0xbb   : > { %v332_v34 = vpop.permute.xlu0 %331 }
  0xbc   : > { %v462_v40 = vsub.f32 %v332_v34, %v238_v37  ;;  %v463_v41 = vsub.f32 %v332_v34, %v239_v38  ;;  %v614_v17 = vadd.f32 %v537_v5, %v536_v4  ;;  %v246_v34 = vld [vmem:[%s1251_s28 + $0xd0] sm:$0xff]  ;;  %v478_v4 = vsub.f32 %v1321_v43, %v254_v61 }
  0xbe   : > { %v526_v44 = vmax.f32 %v462_v40, -6.0  ;;  %v527_v45 = vmax.f32 %v463_v41, -6.0  ;;  %v542_v13 = vmax.f32 %v478_v4, -6.0  ;;  %v266_v4 = vld [vmem:[%s1251_s28 + $0x170] sm:$0xff] }
  0xc0   : > { %v599_v52 = vadd.f32 %v527_v45, %v526_v44  ;;  %v668_v44 = vlaneseq }
  0xc1   : > { %426 = vperm.xlu2 %1044, %v216_v8   ;;  %v464_v8 = vsub.f32 %v1312_v24, %v240_v2 }
  0xc2   : > { %585 = vadd.xlane.f32.xlu1 %v584_v9  ;;  %v1319_v39 = vpop.permute.xlu1 %351  ;;  %v465_v9 = vsub.f32 %v1312_v24, %v241_v3  ;;  %v265_v24 = vld [vmem:[%s1251_s28 + $0x168] sm:$0xff] }
  0xc3   : > { %v347_v48 = vpop.permute.xlu0 %346  ;;  %v528_v18 = vmax.f32 %v464_v8, -6.0  ;;  %v470_v40 = vsub.f32 %v1319_v39, %v246_v34  ;;  %v471_v41 = vsub.f32 %v1319_v39, %v247_v35 }
  0xc4   : > { %v468_v50 = vsub.f32 %v347_v48, %v244_v46  ;;  %v469_v51 = vsub.f32 %v347_v48, %v245_v47  ;;  %v529_v19 = vmax.f32 %v465_v9, -6.0  ;;  %v1355_v48 = vshrl.u32 %v668_v44, 7  ;;  %v257_v44 = vld [vmem:[%s1251_s28 + $0x128] sm:$0xff] }
  0xc5   : > { %v534_v46 = vmax.f32 %v470_v40, -6.0  ;;  %v535_v47 = vmax.f32 %v471_v41, -6.0 }
  0xc6   : > { %376 = vperm.xlu0 %1042, %v206_v10   ;;  %v532_v53 = vmax.f32 %v468_v50, -6.0  ;;  %v533_v54 = vmax.f32 %v469_v51, -6.0  ;;  %v522_v10 = vmax.f32 %v458_v0, -6.0  ;;  %v602_v31 = vadd.f32 %v529_v19, %v528_v18  ;;  %v251_v50 = vld [vmem:[%s1251_s28 + $0xf8] sm:$0xff] }
  0xc7   : > { %v611_v56 = vadd.f32 %v535_v47, %v534_v46  ;;  %v670_v58 = vadd.s32 8, %v1355_v48  ;;  %v672_v8 = vadd.s32 24, %v1355_v48 }
  0xc8   : > { %v608_v62 = vadd.f32 %v533_v54, %v532_v53  ;;  %v1361_v53 = vstv %s984_s20 }
  0xc9   : > { %v703_v60 = vadd.s32 %v1361_v53, %v1355_v48  ;;  %v704_v2 = vadd.s32 %v1361_v53, %v670_v58  ;;  %v706_v19 = vadd.s32 %v1361_v53, %v672_v8  ;;  %v268_v8 = vld [vmem:[%s1251_s28 + $0x180] sm:$0xff] }
  0xca   : > { %v367_v49 = vpop.permute.xlu1 %366 }
  0xcb   : > { %v477_v15 = vsub.f32 %v367_v49, %v253_v7  ;;  %v362_v51 = vpop.permute.xlu0 %361  ;;  %vm735_vm1 = vcmp.lt.s32.totalorder %v703_v60, 512  ;;  %vm736_vm2 = vcmp.lt.s32.totalorder %v704_v2, 512  ;;  %vm738_vm4 = vcmp.lt.s32.totalorder %v706_v19, 512 }
  0xcc   : > { %v475_v54 = vsub.f32 %v362_v51, %v251_v50 }
  0xcd   : > { %v541_v28 = vmax.f32 %v477_v15, -6.0  ;;  %v258_v15 = vld [vmem:[%s1251_s28 + $0x130] sm:$0xff] }
  0xce   : > { %391 = vperm.xlu0 %1042, %v209_v11   ;;  %v523_v11 = vmax.f32 %v459_v1, -6.0  ;;  %v539_v1 = vmax.f32 %v475_v54, -6.0 }
  0xd0   : > { %v593_v26 = vadd.f32 %v523_v11, %v522_v10 }
  0xd2   : > { %v1331_v63 = vpop.permute.xlu1 %381 }
  0xd6   : > { %411 = vperm.xlu0 %1042, %v213_v12   ;;  %v1341_v12 = vpop.permute.xlu2 %401 }
  0xdb   : > { %421 = vperm.xlu1 %1043, %v215_v14   ;;  %v243_v14 = vld [vmem:[%s1251_s28 + $0xb8] sm:$0xff] }
  0xdc   : > { %v467_v22 = vsub.f32 %v1309_v20, %v243_v14 }
  0xde   : > { %436 = vperm.xlu0 %1042, %v218_v16   ;;  %v476_v16 = vsub.f32 %v367_v49, %v252_v6  ;;  %v531_v33 = vmax.f32 %v467_v22, -6.0  ;;  %v1351_v20 = vpop.permute.xlu2 %406  ;;  %v250_v49 = vld [vmem:[%s1251_s28 + $0xf0] sm:$0xff] }
  0xdf   : > { %v474_v39 = vsub.f32 %v362_v51, %v250_v49 }
  0xe0   : > { %v540_v27 = vmax.f32 %v476_v16, -6.0 }
  0xe1   : > { %v538_v0 = vmax.f32 %v474_v39, -6.0  ;;  %v261_v39 = vld [vmem:[%s1251_s28 + $0x148] sm:$0xff] }
  0xe2   : > { %v620_v36 = vadd.f32 %v541_v28, %v540_v27  ;;  %v674_v27 = vadd.s32 40, %v1355_v48  ;;  %v673_v28 = vadd.s32 32, %v1355_v48  ;;  %v485_v60 = vsub.f32 %v1327_v57, %v261_v39 }
  0xe3   : > { %431 = vperm.xlu1 %1043, %v217_v23   ;;  %v264_v23 = vld [vmem:[%s1251_s28 + $0x160] sm:$0xff]  ;;  %v617_v7 = vadd.f32 %v539_v1, %v538_v0  ;;  %v263_v0 = vld [vmem:[%s1251_s28 + $0x158] sm:$0xff] }
  0xe4   : > { %v707_v35 = vadd.s32 %v1361_v53, %v673_v28  ;;  %v277_v28 = vld [vmem:[%s1251_s28 + $0x1c8] sm:$0xff] }
  0xe6   : > { %441 = vperm.xlu0 %1042, %v219_v25   ;;  %v397_v25 = vpop.permute.xlu1 %396  ;;  %v1363_v55 = vpop.permute.xlu2 %416  ;;  %vm739_vm6 = vcmp.lt.s32.totalorder %v707_v35, 512 }
  0xe7   : > { %v488_v29 = vsub.f32 %v397_v25, %v264_v23  ;;  %v489_v30 = vsub.f32 %v397_v25, %v265_v24  ;;  %v482_v23 = vsub.f32 %v1331_v63, %v258_v15 }
  0xe9   : > { %v552_v37 = vmax.f32 %v488_v29, -6.0  ;;  %v553_v38 = vmax.f32 %v489_v30, -6.0  ;;  %v546_v30 = vmax.f32 %v482_v23, -6.0 }
  0xea   : > { %591 = vadd.xlane.f32.xlu2 %v590_v32  ;;  %v530_v32 = vmax.f32 %v466_v21, -6.0  ;;  %v259_v21 = vld [vmem:[%s1251_s28 + $0x138] sm:$0xff] }
  0xeb   : > { %v638_v45 = vadd.f32 %v553_v38, %v552_v37 }
  0xf2   : > { %597 = vadd.xlane.f32.xlu2 %v596_v42  ;;  %v605_v42 = vadd.f32 %v531_v33, %v530_v32  ;;  %v708_v33 = vadd.s32 %v1361_v53, %v674_v27  ;;  %v273_v27 = vld [vmem:[%s1251_s28 + $0x1a8] sm:$0xff] }
  0xf4   : > { %vm740_vm5 = vcmp.lt.s32.totalorder %v708_v33, 512  ;;  %v275_v33 = vld [vmem:[%s1251_s28 + $0x1b8] sm:$0xff] }
  0xfa   : > { %600 = vadd.xlane.f32.xlu2 %v599_v52  ;;  %v671_v52 = vadd.s32 16, %v1355_v48 }
  0xfc   : > { %v705_v59 = vadd.s32 %v1361_v53, %v671_v52  ;;  %v260_v52 = vld [vmem:[%s1251_s28 + $0x140] sm:$0xff] }
  0xfe   : > { %vm737_vm0 = vcmp.lt.s32.totalorder %v705_v59, 512  ;;  %v484_v59 = vsub.f32 %v1327_v57, %v260_v52 }
 0x100   : > { %v548_v2 = vmax.f32 %v484_v59, -6.0 }
 0x102   : > { %609 = vadd.xlane.f32.xlu2 %v608_v62  ;;  %v255_v62 = vld [vmem:[%s1251_s28 + $0x118] sm:$0xff] }
 0x103   : > { %v479_v5 = vsub.f32 %v1321_v43, %v255_v62  ;;  %v262_v62 = vld [vmem:[%s1251_s28 + $0x150] sm:$0xff] }
 0x105   : > { %v543_v14 = vmax.f32 %v479_v5, -6.0  ;;  %v267_v5 = vld [vmem:[%s1251_s28 + $0x178] sm:$0xff] }
 0x106   : > { %v491_v57 = vsub.f32 %v1341_v12, %v267_v5  ;;  %v283_v5 = vld [vmem:[%s1251_s28 + $0x1f8] sm:$0xff] }
 0x107   : > { %v623_v25 = vadd.f32 %v543_v14, %v542_v13  ;;  %v490_v13 = vsub.f32 %v1341_v12, %v266_v4  ;;  %v492_v14 = vsub.f32 %v1351_v20, %v268_v8  ;;  %v282_v4 = vld [vmem:[%s1251_s28 + $0x1f0] sm:$0xff] }
 0x109   : > { %v554_v19 = vmax.f32 %v490_v13, -6.0  ;;  %v556_v12 = vmax.f32 %v492_v14, -6.0 }
 0x10a   : > { %615 = vadd.xlane.f32.xlu2 %v614_v17 }
 0x10d   : > { %594 = vadd.xlane.f32.xlu1 %v593_v26  ;;  %v483_v26 = vsub.f32 %v1331_v63, %v259_v21  ;;  %v555_v21 = vmax.f32 %v491_v57, -6.0 }
 0x10f   : > { %v547_v32 = vmax.f32 %v483_v26, -6.0  ;;  %v272_v26 = vld [vmem:[%s1251_s28 + $0x1a0] sm:$0xff] }
 0x110   : > { %603 = vadd.xlane.f32.xlu0 %v602_v31  ;;  %v496_v35 = vsub.f32 %v1363_v55, %v272_v26 }
 0x111   : > { %v629_v37 = vadd.f32 %v547_v32, %v546_v30  ;;  %v274_v32 = vld [vmem:[%s1251_s28 + $0x1b0] sm:$0xff] }
 0x112   : > { %621 = vadd.xlane.f32.xlu2 %v620_v36 }
 0x115   : > { %606 = vadd.xlane.f32.xlu1 %v605_v42  ;;  %v256_v42 = vld [vmem:[%s1251_s28 + $0x120] sm:$0xff] }
 0x118   : > { %639 = vadd.xlane.f32.xlu0 %v638_v45 }
 0x11c   : > { %v580_v6 = vpop.xlane.xlu2 %579 }
 0x11d   : > { %612 = vadd.xlane.f32.xlu1 %v611_v56  ;;  %v574_v3 = vpop.xlane.xlu0 %573  ;;  %v769_v9 = vsel %vm737_vm0, %v580_v6, 0.0 }
 0x11e   : > { %v767_v10 = vsel %vm735_vm1, %v574_v3, 0.0  ;;  %v803_v17 = vsel %vm799_vm3, %v769_v9, 0.0  ;;  %v549_v3 = vmax.f32 %v485_v60, -6.0  ;;  %v269_v9 = vld [vmem:[%s1251_s28 + $0x188] sm:$0xff] }
 0x11f   : > { %v800_v18 = vsel %vm799_vm3, %v767_v10, 0.0 }
 0x120   : > { %v632_v15 = vadd.f32 %v549_v3, %v548_v2 }
 0x125   : > { %v577_v11 = vpop.xlane.xlu1 %576  ;;  %618 = vadd.xlane.f32.xlu1 %v617_v7  ;;  %v589_v36 = vpop.xlane.xlu0 %588 }
 0x126   : > { %v768_v16 = vsel %vm736_vm2, %v577_v11, 0.0  ;;  %v772_v40 = vsel %vm740_vm5, %v589_v36, 0.0  ;;  %v497_v36 = vsub.f32 %v1363_v55, %v273_v27 }
 0x127   : > { %v801_v43 = vsel %vm799_vm3, %v768_v16, 0.0  ;;  %v809_v49 = vsel %vm799_vm3, %v772_v40, 0.0  ;;  %v493_v16 = vsub.f32 %v1351_v20, %v269_v9  ;;  %v276_v20 = vld [vmem:[%s1251_s28 + $0x1c0] sm:$0xff] }
 0x128   : > { %v802_v22 = vadd.f32 %v801_v43, %v800_v18  ;;  %v270_v18 = vld [vmem:[%s1251_s28 + $0x190] sm:$0xff]  ;;  %v271_v43 = vld [vmem:[%s1251_s28 + $0x198] sm:$0xff] }
 0x129   : > { %v557_v23 = vmax.f32 %v493_v16, -6.0 }
 0x12a   : > { %v804_v24 = vadd.f32 %v803_v17, %v802_v22 }
 0x12d   : > { %v583_v29 = vpop.xlane.xlu1 %582  ;;  %624 = vadd.xlane.f32.xlu1 %v623_v25 }
 0x12e   : > { %v770_v31 = vsel %vm738_vm4, %v583_v29, 0.0  ;;  %v427_v29 = vpop.permute.xlu2 %426 }
 0x12f   : > { %v805_v34 = vsel %vm799_vm3, %v770_v31, 0.0  ;;  %v500_v40 = vsub.f32 %v427_v29, %v276_v20  ;;  %v678_v20 = vadd.s32 72, %v1355_v48 }
 0x130   : > { %v806_v63 = vadd.f32 %v805_v34, %v804_v24  ;;  %v641_v34 = vadd.f32 %v555_v21, %v554_v19 }
 0x131   : > { %v564_v52 = vmax.f32 %v500_v40, -6.0 }
 0x135   : > { %v586_v38 = vpop.xlane.xlu1 %585  ;;  %630 = vadd.xlane.f32.xlu1 %v629_v37  ;;  %v644_v37 = vadd.f32 %v557_v23, %v556_v12 }
 0x136   : > { %v771_v41 = vsel %vm739_vm6, %v586_v38, 0.0 }
 0x137   : > { %v807_v45 = vsel %vm799_vm3, %v771_v41, 0.0  ;;  %v501_v41 = vsub.f32 %v427_v29, %v277_v28 }
 0x138   : > { %v808_v46 = vadd.f32 %v807_v45, %v806_v63  ;;  %v377_v47 = vpop.permute.xlu0 %376 }
 0x139   : > { %v480_v50 = vsub.f32 %v377_v47, %v256_v42  ;;  %v481_v51 = vsub.f32 %v377_v47, %v257_v44  ;;  %v561_v47 = vmax.f32 %v497_v36, -6.0  ;;  %v565_v39 = vmax.f32 %v501_v41, -6.0 }
 0x13a   : > { %v1394_v54 = vadd.f32 %v809_v49, %v808_v46  ;;  %v560_v46 = vmax.f32 %v496_v35, -6.0  ;;  %v680_v35 = vadd.s32 88, %v1355_v48 }
 0x13b   : > { %v544_v56 = vmax.f32 %v480_v50, -6.0  ;;  %v545_v58 = vmax.f32 %v481_v51, -6.0  ;;  %v280_v50 = vld [vmem:[%s1251_s28 + $0x1e0] sm:$0xff]  ;;  %v281_v51 = vld [vmem:[%s1251_s28 + $0x1e8] sm:$0xff]  ;;  %v656_v3 = vadd.f32 %v565_v39, %v564_v52  ;;  %v683_v39 = vadd.s32 112, %v1355_v48 }
 0x13d   : > { %v626_v61 = vadd.f32 %v545_v58, %v544_v56  ;;  %v278_v56 = vld [vmem:[%s1251_s28 + $0x1d0] sm:$0xff]  ;;  %v279_v58 = vld [vmem:[%s1251_s28 + $0x1d8] sm:$0xff]  ;;  %s1091_s28 = scalar_lea.hbm %s1090_s27, 8 }
 0x13e   : > { %p1092_p6 = scmp.ne.s32.totalorder %s1090_s27, %s1091_s28  ;;  %p1097_p3 = scmp.lt.s32.totalorder %s1095_s30, %s1091_s28 }
 0x13f   : > { %627 = vadd.xlane.f32.xlu2 %v626_v61 }
 0x140   : > { %v392_v1 = vpop.permute.xlu0 %391  ;;  %p1093_p13 = pnand %p1092_p6, %p1211_p11  ;;  %p1098_p4 = por %p1097_p3, %p1096_p1 }
 0x141   : > { %v486_v6 = vsub.f32 %v392_v1, %v262_v62  ;;  %v487_v7 = vsub.f32 %v392_v1, %v263_v0  ;;  %v650_v62 = vadd.f32 %v561_v47, %v560_v46  ;;  %v681_v46 = vadd.s32 96, %v1355_v48 }
 0x142   : > { %p1094_p0 = pneg %p1093_p13 }
 0x143   : > { %v550_v10 = vmax.f32 %v486_v6, -6.0  ;;  %v551_v11 = vmax.f32 %v487_v7, -6.0 }
 0x144   : > { %p1099_p7 = pnand %p1098_p4, %p1094_p0 }
 0x145   : > { %v635_v17 = vadd.f32 %v551_v11, %v550_v10 }
 0x147   : > { %633 = vadd.xlane.f32.xlu2 %v632_v15  ;;  %636 = vadd.xlane.f32.xlu1 %v635_v17 }
 0x148   : > { %v412_v22 = vpop.permute.xlu0 %411 }
 0x149   : > { %v494_v24 = vsub.f32 %v412_v22, %v270_v18  ;;  %v495_v25 = vsub.f32 %v412_v22, %v271_v43  ;;  %v675_v43 = vadd.s32 48, %v1355_v48  ;;  %v676_v22 = vadd.s32 56, %v1355_v48 }
 0x14b   : > { %v558_v30 = vmax.f32 %v494_v24, -6.0  ;;  %v559_v31 = vmax.f32 %v495_v25, -6.0  ;;  %v709_v12 = vadd.s32 %v1361_v53, %v675_v43  ;;  %v710_v23 = vadd.s32 %v1361_v53, %v676_v22 }
 0x14c   : > { %v677_v24 = vadd.s32 64, %v1355_v48 }
 0x14d   : > { %v422_v63 = vpop.permute.xlu1 %421  ;;  %v647_v38 = vadd.f32 %v559_v31, %v558_v30  ;;  %vm741_vm7 = vcmp.lt.s32.totalorder %v709_v12, 512  ;;  %vm742_vm8 = vcmp.lt.s32.totalorder %v710_v23, 512  ;;  %v712_v31 = vadd.s32 %v1361_v53, %v678_v20 }
 0x14e   : > { %v498_v42 = vsub.f32 %v422_v63, %v274_v32  ;;  %v499_v44 = vsub.f32 %v422_v63, %v275_v33  ;;  %v711_v27 = vadd.s32 %v1361_v53, %v677_v24  ;;  %v679_v33 = vadd.s32 80, %v1355_v48 }
 0x14f   : > { %642 = vadd.xlane.f32.xlu2 %v641_v34  ;;  %645 = vadd.xlane.f32.xlu1 %v644_v37  ;;  %vm744_vm10 = vcmp.lt.s32.totalorder %v712_v31, 512  ;;  %v690_v20 = vadd.s32 168, %v1355_v48 }
 0x150   : > { %648 = vadd.xlane.f32.xlu0 %v647_v38  ;;  %v437_v45 = vpop.permute.xlu0 %436  ;;  %v562_v49 = vmax.f32 %v498_v42, -6.0  ;;  %v563_v55 = vmax.f32 %v499_v44, -6.0  ;;  %vm743_vm9 = vcmp.lt.s32.totalorder %v711_v27, 512  ;;  %v713_v37 = vadd.s32 %v1361_v53, %v679_v33 }
 0x151   : > { %v504_v59 = vsub.f32 %v437_v45, %v280_v50  ;;  %v505_v60 = vsub.f32 %v437_v45, %v281_v51  ;;  %v714_v42 = vadd.s32 %v1361_v53, %v680_v35  ;;  %v715_v51 = vadd.s32 %v1361_v53, %v681_v46 }
 0x152   : > { %v653_v0 = vadd.f32 %v563_v55, %v562_v49  ;;  %vm745_vm11 = vcmp.lt.s32.totalorder %v713_v37, 512  ;;  %v689_v27 = vadd.s32 160, %v1355_v48 }
 0x153   : > { %v568_v6 = vmax.f32 %v504_v59, -6.0  ;;  %v569_v7 = vmax.f32 %v505_v60, -6.0  ;;  %vm746_vm12 = vcmp.lt.s32.totalorder %v714_v42, 512  ;;  %v684_v59 = vadd.s32 120, %v1355_v48 }
 0x154   : > { %vm747_vm13 = vcmp.lt.s32.totalorder %v715_v51, 512  ;;  %v692_v42 = vadd.s32 184, %v1355_v48  ;;  %v694_v51 = vadd.s32 200, %v1355_v48 }
 0x155   : > { %v432_v61 = vpop.permute.xlu1 %431  ;;  %v662_v15 = vadd.f32 %v569_v7, %v568_v6  ;;  %v686_v7 = vadd.s32 136, %v1355_v48 }
 0x156   : > { %v502_v1 = vsub.f32 %v432_v61, %v278_v56  ;;  %v503_v2 = vsub.f32 %v432_v61, %v279_v58 }
 0x157   : > { %651 = vadd.xlane.f32.xlu2 %v650_v62  ;;  %654 = vadd.xlane.f32.xlu1 %v653_v0 }
 0x158   : > { %657 = vadd.xlane.f32.xlu0 %v656_v3  ;;  %v442_v8 = vpop.permute.xlu0 %441  ;;  %v566_v9 = vmax.f32 %v502_v1, -6.0  ;;  %v567_v10 = vmax.f32 %v503_v2, -6.0  ;;  %v717_v1 = vadd.s32 %v1361_v53, %v683_v39  ;;  %v718_v2 = vadd.s32 %v1361_v53, %v684_v59 }
 0x159   : > { %v506_v11 = vsub.f32 %v442_v8, %v282_v4  ;;  %v507_v13 = vsub.f32 %v442_v8, %v283_v5  ;;  %v685_v4 = vadd.s32 128, %v1355_v48  ;;  %v726_v39 = vadd.s32 %v1361_v53, %v692_v42 }
 0x15a   : > { %v659_v16 = vadd.f32 %v567_v10, %v566_v9  ;;  %vm749_vm15 = vcmp.lt.s32.totalorder %v717_v1, 512  ;;  %vm750_vm0 = vcmp.lt.s32.totalorder %v718_v2, 512  ;;  %v696_v1 = vadd.s32 216, %v1355_v48 }
 0x15b   : > { %v570_v57 = vmax.f32 %v506_v11, -6.0  ;;  %v571_v14 = vmax.f32 %v507_v13, -6.0  ;;  %v719_v10 = vadd.s32 %v1361_v53, %v685_v4 }
 0x15d   : > { %v665_v17 = vadd.f32 %v571_v14, %v570_v57  ;;  %v592_v18 = vpop.xlane.xlu2 %591  ;;  %v720_v57 = vadd.s32 %v1361_v53, %v686_v7  ;;  %vm751_vm1 = vcmp.lt.s32.totalorder %v719_v10, 512 }
 0x15e   : > { %v773_v26 = vsel %vm741_vm7, %v592_v18, 0.0 }
 0x15f   : > { %660 = vadd.xlane.f32.xlu2 %v659_v16  ;;  %663 = vadd.xlane.f32.xlu1 %v662_v15  ;;  %v811_v30 = vsel %vm799_vm3, %v773_v26, 0.0  ;;  %v687_v16 = vadd.s32 144, %v1355_v48  ;;  %vm752_vm2 = vcmp.lt.s32.totalorder %v720_v57, 512 }
 0x160   : > { %666 = vadd.xlane.f32.xlu0 %v665_v17  ;;  %v812_v34 = vadd.f32 %v811_v30, %v1394_v54  ;;  %v682_v54 = vadd.s32 104, %v1355_v48 }
 0x161   : > { %v721_v22 = vadd.s32 %v1361_v53, %v687_v16 }
 0x162   : > { %v716_v52 = vadd.s32 %v1361_v53, %v682_v54 }
 0x163   : > { %vm753_vm4 = vcmp.lt.s32.totalorder %v721_v22, 512 }
 0x164   : > { %vm748_vm14 = vcmp.lt.s32.totalorder %v716_v52, 512 }
 0x165   : > { %v598_v21 = vpop.xlane.xlu2 %597 }
 0x166   : > { %v775_v36 = vsel %vm743_vm9, %v598_v21, 0.0  ;;  %v688_v21 = vadd.s32 152, %v1355_v48  ;;  %vm758_vm9 = vcmp.lt.s32.totalorder %v726_v39, 512 }
 0x167   : > { %v815_v40 = vsel %vm799_vm3, %v775_v36, 0.0  ;;  %v723_v36 = vadd.s32 %v1361_v53, %v689_v27 }
 0x168   : > { %v722_v26 = vadd.s32 %v1361_v53, %v688_v21 }
 0x169   : > { %vm755_vm6 = vcmp.lt.s32.totalorder %v723_v36, 512 }
 0x16a   : > { %vm754_vm5 = vcmp.lt.s32.totalorder %v722_v26, 512 }
 0x16d   : > { %v601_v28 = vpop.xlane.xlu2 %600 }
 0x16e   : > { %v776_v44 = vsel %vm744_vm10, %v601_v28, 0.0 }
 0x16f   : > { %v817_v49 = vsel %vm799_vm3, %v776_v44, 0.0  ;;  %v693_v44 = vadd.s32 192, %v1355_v48 }
 0x175   : > { %v610_v41 = vpop.xlane.xlu2 %609 }
 0x176   : > { %v779_v3 = vsel %vm747_vm13, %v610_v41, 0.0 }
 0x177   : > { %v823_v8 = vsel %vm799_vm3, %v779_v3, 0.0 }
 0x17d   : > { %v616_v62 = vpop.xlane.xlu2 %615 }
 0x17e   : > { %v781_v13 = vsel %vm749_vm15, %v616_v62, 0.0  ;;  %v728_v62 = vadd.s32 %v1361_v53, %v694_v51 }
 0x17f   : > { %v827_v43 = vsel %vm799_vm3, %v781_v13, 0.0  ;;  %v730_v13 = vadd.s32 %v1361_v53, %v696_v1 }
 0x180   : > { %v595_v19 = vpop.xlane.xlu1 %594 }
 0x181   : > { %v774_v29 = vsel %vm742_vm8, %v595_v19, 0.0  ;;  %vm762_vm13 = vcmp.lt.s32.totalorder %v730_v13, 512 }
 0x182   : > { %v813_v32 = vsel %vm799_vm3, %v774_v29, 0.0 }
 0x183   : > { %v814_v63 = vadd.f32 %v813_v32, %v812_v34  ;;  %v604_v47 = vpop.xlane.xlu0 %603  ;;  %v691_v32 = vadd.s32 176, %v1355_v48 }
 0x184   : > { %v777_v50 = vsel %vm745_vm11, %v604_v47, 0.0  ;;  %vm760_vm11 = vcmp.lt.s32.totalorder %v728_v62, 512 }
 0x185   : > { %v816_v45 = vadd.f32 %v815_v40, %v814_v63  ;;  %v819_v58 = vsel %vm799_vm3, %v777_v50, 0.0  ;;  %v622_v18 = vpop.xlane.xlu2 %621  ;;  %v724_v63 = vadd.s32 %v1361_v53, %v690_v20 }
 0x186   : > { %v783_v23 = vsel %vm751_vm1, %v622_v18, 0.0  ;;  %v698_v18 = vadd.s32 232, %v1355_v48 }
 0x187   : > { %v818_v55 = vadd.f32 %v817_v49, %v816_v45  ;;  %v831_v28 = vsel %vm799_vm3, %v783_v23, 0.0  ;;  %vm756_vm7 = vcmp.lt.s32.totalorder %v724_v63, 512 }
 0x188   : > { %v607_v25 = vpop.xlane.xlu1 %606  ;;  %v732_v20 = vadd.s32 %v1361_v53, %v698_v18 }
 0x189   : > { %v778_v56 = vsel %vm746_vm12, %v607_v25, 0.0  ;;  %v820_v61 = vadd.f32 %v819_v58, %v818_v55 }
 0x18a   : > { %v821_v0 = vsel %vm799_vm3, %v778_v56, 0.0  ;;  %v727_v56 = vadd.s32 %v1361_v53, %v693_v44  ;;  %vm764_vm15 = vcmp.lt.s32.totalorder %v732_v20, 512 }
 0x18b   : > { %v822_v5 = vadd.f32 %v821_v0, %v820_v61  ;;  %v640_v54 = vpop.xlane.xlu0 %639  ;;  %v695_v0 = vadd.s32 208, %v1355_v48 }
 0x18c   : > { %vm759_vm10 = vcmp.lt.s32.totalorder %v727_v56, 512 }
 0x18d   : > { %v824_v11 = vadd.f32 %v823_v8, %v822_v5 }
 0x190   : > { %v613_v38 = vpop.xlane.xlu1 %612 }
 0x191   : > { %v780_v6 = vsel %vm748_vm14, %v613_v38, 0.0  ;;  %v725_v38 = vadd.s32 %v1361_v53, %v691_v32 }
 0x192   : > { %v825_v9 = vsel %vm799_vm3, %v780_v6, 0.0 }
 0x193   : > { %v826_v15 = vadd.f32 %v825_v9, %v824_v11  ;;  %vm757_vm8 = vcmp.lt.s32.totalorder %v725_v38, 512  ;;  %v697_v9 = vadd.s32 224, %v1355_v48  ;;  %v729_v11 = vadd.s32 %v1361_v53, %v695_v0 }
 0x195   : > { %v828_v12 = vadd.f32 %v827_v43, %v826_v15  ;;  %vm761_vm12 = vcmp.lt.s32.totalorder %v729_v11, 512  ;;  %v699_v43 = vadd.s32 240, %v1355_v48 }
 0x198   : > { %v619_v60 = vpop.xlane.xlu1 %618 }
 0x199   : > { %v782_v17 = vsel %vm750_vm0, %v619_v60, 0.0  ;;  %v789_v60 = vsel %vm757_vm8, %v640_v54, 0.0 }
 0x19a   : > { %v829_v19 = vsel %vm799_vm3, %v782_v17, 0.0  ;;  %v843_v2 = vsel %vm799_vm3, %v789_v60, 0.0  ;;  %v731_v17 = vadd.s32 %v1361_v53, %v697_v9 }
 0x19b   : > { %v830_v24 = vadd.f32 %v829_v19, %v828_v12  ;;  %v700_v12 = vadd.s32 248, %v1355_v48 }
 0x19c   : > { %vm763_vm14 = vcmp.lt.s32.totalorder %v731_v17, 512 }
 0x19d   : > { %v832_v33 = vadd.f32 %v831_v28, %v830_v24  ;;  %v733_v28 = vadd.s32 %v1361_v53, %v699_v43 }
 0x19f   : > { %vm765_vm0 = vcmp.lt.s32.totalorder %v733_v28, 512 }
 0x1a0   : > { %v625_v14 = vpop.xlane.xlu1 %624 }
 0x1a1   : > { %v784_v25 = vsel %vm752_vm2, %v625_v14, 0.0 }
 0x1a2   : > { %v833_v29 = vsel %vm799_vm3, %v784_v25, 0.0 }
 0x1a3   : > { %v834_v37 = vadd.f32 %v833_v29, %v832_v33 }
 0x1a8   : > { %v631_v30 = vpop.xlane.xlu1 %630 }
 0x1a9   : > { %v786_v40 = vsel %vm754_vm5, %v631_v30, 0.0 }
 0x1aa   : > { %v837_v45 = vsel %vm799_vm3, %v786_v40, 0.0 }
 0x1b2   : > { %v628_v31 = vpop.xlane.xlu2 %627 }
 0x1b3   : > { %v785_v34 = vsel %vm753_vm4, %v628_v31, 0.0  ;;  %v734_v31 = vadd.s32 %v1361_v53, %v700_v12 }
 0x1b4   : > { %v835_v35 = vsel %vm799_vm3, %v785_v34, 0.0 }
 0x1b5   : > { %v836_v41 = vadd.f32 %v835_v35, %v834_v37  ;;  %vm766_vm1 = vcmp.lt.s32.totalorder %v734_v31, 512 }
 0x1b7   : > { %v838_v55 = vadd.f32 %v837_v45, %v836_v41 }
 0x1ba   : > { %v634_v46 = vpop.xlane.xlu2 %633  ;;  %v637_v47 = vpop.xlane.xlu1 %636 }
 0x1bb   : > { %v787_v49 = vsel %vm755_vm6, %v634_v46, 0.0  ;;  %v788_v50 = vsel %vm756_vm7, %v637_v47, 0.0 }
 0x1bc   : > { %v839_v52 = vsel %vm799_vm3, %v787_v49, 0.0  ;;  %v841_v59 = vsel %vm799_vm3, %v788_v50, 0.0 }
 0x1bd   : > { %v840_v58 = vadd.f32 %v839_v52, %v838_v55 }
 0x1bf   : > { %v842_v61 = vadd.f32 %v841_v59, %v840_v58 }
 0x1c1   : > { %v844_v6 = vadd.f32 %v843_v2, %v842_v61 }
 0x1c2   : > { %v643_v3 = vpop.xlane.xlu2 %642  ;;  %v646_v4 = vpop.xlane.xlu1 %645 }
 0x1c3   : > { %v790_v5 = vsel %vm758_vm9, %v643_v3, 0.0  ;;  %v791_v7 = vsel %vm759_vm10, %v646_v4, 0.0  ;;  %v649_v8 = vpop.xlane.xlu0 %648 }
 0x1c4   : > { %v845_v10 = vsel %vm799_vm3, %v790_v5, 0.0  ;;  %v847_v14 = vsel %vm799_vm3, %v791_v7, 0.0  ;;  %v792_v15 = vsel %vm760_vm11, %v649_v8, 0.0 }
 0x1c5   : > { %v846_v57 = vadd.f32 %v845_v10, %v844_v6  ;;  %v849_v19 = vsel %vm799_vm3, %v792_v15, 0.0 }
 0x1c7   : > { %v848_v16 = vadd.f32 %v847_v14, %v846_v57 }
 0x1c9   : > { %v850_v23 = vadd.f32 %v849_v19, %v848_v16 }
 0x1ca   : > { %v652_v21 = vpop.xlane.xlu2 %651  ;;  %v655_v22 = vpop.xlane.xlu1 %654 }
 0x1cb   : > { %v793_v24 = vsel %vm761_vm12, %v652_v21, 0.0  ;;  %v794_v25 = vsel %vm762_vm13, %v655_v22, 0.0  ;;  %v658_v26 = vpop.xlane.xlu0 %657 }
 0x1cc   : > { %v851_v27 = vsel %vm799_vm3, %v793_v24, 0.0  ;;  %v853_v30 = vsel %vm799_vm3, %v794_v25, 0.0  ;;  %v795_v33 = vsel %vm763_vm14, %v658_v26, 0.0 }
 0x1cd   : > { %v852_v29 = vadd.f32 %v851_v27, %v850_v23  ;;  %v855_v48 = vsel %vm799_vm3, %v795_v33, 0.0 }
 0x1cf   : > { %v854_v32 = vadd.f32 %v853_v30, %v852_v29 }
 0x1d1   : > { %v856_v36 = vadd.f32 %v855_v48, %v854_v32 }
 0x1d2   : > { %v661_v34 = vpop.xlane.xlu2 %660  ;;  %v664_v35 = vpop.xlane.xlu1 %663 }
 0x1d3   : > { %v796_v63 = vsel %vm764_vm15, %v661_v34, 0.0  ;;  %v797_v37 = vsel %vm765_vm0, %v664_v35, 0.0  ;;  %v667_v38 = vpop.xlane.xlu0 %666 }
 0x1d4   : > { %v857_v40 = vsel %vm799_vm3, %v796_v63, 0.0  ;;  %v798_v42 = vsel %vm766_vm1, %v667_v38, 0.0  ;;  %v859_v53 = vsel %vm799_vm3, %v797_v37, 0.0 }
 0x1d5   : > { %v858_v41 = vadd.f32 %v857_v40, %v856_v36  ;;  %v861_v45 = vsel %vm799_vm3, %v798_v42, 0.0 }
 0x1d7   : > { %v860_v44 = vadd.f32 %v859_v53, %v858_v41 }
 0x1d9   : > { %v862_v46 = vadd.f32 %v861_v45, %v860_v44 }
 0x1db   : > { %863 = vadd.xlane.f32.xlu2 %v862_v46 }
 0x24e   : > { %v864_v47 = vpop.xlane.xlu2 %863 }
 0x24f   : > { %v865_v54 = vrot.slane %v864_v47, 4 }
 0x251   : > { %v866_v49 = vadd.f32 %v865_v54, %v864_v47 }
 0x253   : > { %v867_v55 = vrot.slane %v866_v49, 2 }
 0x255   : > { %v868_v50 = vadd.f32 %v867_v55, %v866_v49 }
 0x257   : > { %v869_v51 = vrot.slane %v868_v50, 1 }
 0x259   : > { %v870_v52 = vadd.f32 %v869_v51, %v868_v50 }
 0x25b   : > { %991 = vpush %v870_v52 }
 0x28c   : > { %s992_s24 = spop %991 }
 0x28d   : > { %v872_v39 = vstv %s992_s24 }
 0x28e   : > { %873 = vst [vmem:[%s180_s17] sm:$0xff] %v872_v39 }
 0x28f   : > { %1102 = shalt.err (!%p1099_p7)
}
 0x290   : > { %995 = dma.vmem_to_hbm [thread:$0]  (%p1211_p11), %s888_s19, 128, %s890_s23, %s875_s26  }
 0x291 PF: > { %s901_s25 = sand.u32 1, %s1129_s9   ;;  %p1545_p5 = scmp.ge.s32.totalorder %s1141_s12, 2 }
 0x292   : > { %s902_s5 = scalar_lea.sflag [#allocation4], %s901_s25 }
 0x293   : > { %p1002_p8 = pnand %p1545_p5, %p1215_p12 }
 0x295   : > { %p1003_p10 = pneg %p1002_p8 }
 0x297   : > { %1124 = dma.done.wait (%p1003_p10), %s902_s5, 128  }
 0x298   : > { %1126 = vsyncadd (%p1003_p10), %s902_s5, 4294967168  ;;  %p15_p2 = scmp.ge.s32.totalorder %s1186_s15, 4   ;;  %s1546_s9 = smov %s1133_s10 }
 0x299   : > { %s1547_s10 = smov %s1137_s11  ;;  %s1548_s11 = smov %s1198_s18 }
 0x29a   : > { %s1549_s12 = smov %s1186_s15  ;;  %17 = sbr.rel (!%p15_p2) target bundleno = 5 (0x5), region = 76 }
 0x29f   :  { %908 = vsyncpa [#allocation3], 1 }
 0x2a0   :  { %910 = vsyncpa [#allocation3 + $0x1], 1 }
 0x2a1   :  { %911 = vsyncpa [#allocation4], 1 }
 0x2a2   :  { %913 = vsyncpa [#allocation4 + $0x1], 1 }

</bundles_post_ra>
